<compile_context>
chip_gen: v5e
topology: v5e:2x2
jax: 0.10.0
libtpu: 0.0.40
codegen_flags: <defaults>
</compile_context>

<pallas_src>
import functools

import jax
import jax.numpy as jnp
from jax import lax
from jax.experimental import pallas as pl
from jax.experimental.pallas import tpu as pltpu


# ----------------------------------------------------------------------------
# Fused kernel: projections + gating + chunked GLA + RMSNorm + o_proj
# ----------------------------------------------------------------------------
def _hgrn2_fused_kernel(x_ref, wq_ref, wf_ref, wi_ref, gnw_ref, wo_ref,
                        y_ref, state_ref, *,
                        num_heads, head_f, head_i, scale, eps, mxu_dtype):
    c = pl.program_id(1)
    num_chunks = pl.num_programs(1)

    # Reset the recurrent state at the start of every batch element's sweep.
    @pl.when(c == 0)
    def _():
        state_ref[...] = jnp.zeros_like(state_ref)

    cast = lambda t: t.astype(mxu_dtype)

    x = x_ref[0]                                     # (CT, H)
    ct = x.shape[0]

    # ---- fused q/f/i projections (MXU, f32 accumulation) --------------------
    xm = cast(x)
    qp = jnp.dot(xm, wq_ref[...], preferred_element_type=jnp.float32)   # (CT, F)
    fp = jnp.dot(xm, wf_ref[...], preferred_element_type=jnp.float32)   # (CT, F)
    v = jnp.dot(xm, wi_ref[...], preferred_element_type=jnp.float32)    # (CT, H)

    # ---- gating nonlinearities (f32 on VPU/EUP) ------------------------------
    q = qp * (1.0 / (1.0 + jnp.exp(-qp)))                           # swish
    g = jnp.minimum(fp, 0.0) - jnp.log1p(jnp.exp(-jnp.abs(fp)))     # logsigmoid
    k = 1.0 / (1.0 + jnp.exp(fp))           # sigmoid(-f) == 1 - exp(g), no cancellation

    # ---- chunk-form gated linear attention -----------------------------------
    row = lax.broadcasted_iota(jnp.int32, (ct, ct), 0)
    col = lax.broadcasted_iota(jnp.int32, (ct, ct), 1)
    causal = row >= col
    lower = causal.astype(jnp.float32)

    # Inclusive prefix-sum of the log-gates along time (kept in f32: it feeds exp).
    G = jnp.dot(lower, g, preferred_element_type=jnp.float32)       # (CT, F)
    G_last = G[ct - 1:ct, :]                                        # (1, F)

    qg = q * jnp.exp(G) * scale                                     # (CT, F)
    # TODO(synk): exp(-G) can overflow f32 if a within-chunk gate sum drops
    # below ~-88; fla's chunk_gla uses secondary sub-chunk normalisation for
    # that.  Chunks are capped at 64 steps (the module's fused_recurrent regime).
    kg = k * jnp.exp(-G)                                            # (CT, F)

    o_heads = []
    for h in range(num_heads):
        fsl = slice(h * head_f, (h + 1) * head_f)
        isl = slice(h * head_i, (h + 1) * head_i)
        qh, kh, vh = qg[:, fsl], kg[:, fsl], v[:, isl]
        s_prev = state_ref[h]                        # (Di, Df) f32, transposed state

        # intra-chunk attention
        a = lax.dot_general(cast(qh), cast(kh), (((1,), (1,)), ((), ())),
                            preferred_element_type=jnp.float32)     # (CT, CT)
        a = jnp.where(causal, a, 0.0)
        o_h = jnp.dot(cast(a), cast(vh), preferred_element_type=jnp.float32)
        # inter-chunk contribution from the carried state
        o_h = o_h + lax.dot_general(cast(qh), cast(s_prev),
                                    (((1,), (1,)), ((), ())),
                                    preferred_element_type=jnp.float32)  # (CT, Di)
        o_heads.append(o_h)

    o = jnp.concatenate(o_heads, axis=-1)                           # (CT, H) lane-dense

    # ---- carry the recurrent state to the next time chunk --------------------
    @pl.when(c + 1 < num_chunks)
    def _():
        decay = jnp.exp(G_last)                                     # (1, F), <= 1
        khat = k * jnp.exp(G_last - G)                              # (CT, F), factors <= 1
        for h in range(num_heads):
            fsl = slice(h * head_f, (h + 1) * head_f)
            isl = slice(h * head_i, (h + 1) * head_i)
            s_upd = lax.dot_general(cast(v[:, isl]), cast(khat[:, fsl]),
                                    (((0,), (0,)), ((), ())),
                                    preferred_element_type=jnp.float32)   # (Di, Df)
            state_ref[h] = state_ref[h] * decay[:, fsl] + s_upd

    # ---- RMSNorm + output projection -----------------------------------------
    var = jnp.mean(o * o, axis=-1, keepdims=True)
    on = o * lax.rsqrt(var + eps) * gnw_ref[...]
    y = jnp.dot(cast(on), wo_ref[...], preferred_element_type=jnp.float32)
    y_ref[0] = y.astype(y_ref.dtype)


# ----------------------------------------------------------------------------
# Wrapper
# ----------------------------------------------------------------------------
def hgrn2_attention_forward(x, params, *, num_heads, expand_ratio,
                            eps=1e-5, mxu_dtype=None, chunk_size=64):
    B, T, H = x.shape
    head_f = expand_ratio
    head_i = H // num_heads
    forget_dim = num_heads * head_f
    dt = x.dtype

    # MXU operand dtype: native bf16 if the model runs in bf16 (or explicitly
    # requested); otherwise keep the input dtype.  Accumulation is always f32.
    if mxu_dtype is None:
        mxu_dtype = jnp.bfloat16 if dt == jnp.bfloat16 else dt

    # Time-chunking: one chunk for T <= chunk_size (fused_recurrent regime),
    # otherwise equal chunks with the GLA state carried in VMEM scratch.
    if T <= chunk_size:
        ct = T
    else:
        assert T % chunk_size == 0, "T must be a multiple of chunk_size"
        ct = chunk_size
    nc = T // ct

    # PyTorch Linear weights are [out, in]; transpose to [in, out] and cast to
    # the MXU operand dtype so the DMA'd weight bytes are already narrow.
    wq = params["q_proj"].T.astype(mxu_dtype)          # (H, F)
    wf = params["f_proj"].T.astype(mxu_dtype)          # (H, F)
    wi = params["i_proj"].T.astype(mxu_dtype)          # (H, H)
    wo = params["o_proj"].T.astype(mxu_dtype)          # (H, H)
    gnw = params["g_norm_weight"].reshape(1, H).astype(jnp.float32)

    kernel = functools.partial(
        _hgrn2_fused_kernel,
        num_heads=num_heads, head_f=head_f, head_i=head_i,
        scale=head_f ** -0.5, eps=eps, mxu_dtype=mxu_dtype)

    wfull = lambda b, c: (0, 0)

    # TODO(synk): for very large hidden sizes the (H,H)/(H,F) weights should be
    # K-tiled rather than held whole in VMEM; at the module's default sizes they
    # fit well under the 32 MiB scoped budget (safe on 64 MiB-VMEM v7x too).
    y = pl.pallas_call(
        kernel,
        grid=(B, nc),
        in_specs=[
            pl.BlockSpec((1, ct, H), lambda b, c: (b, c, 0)),
            pl.BlockSpec((H, forget_dim), wfull),
            pl.BlockSpec((H, forget_dim), wfull),
            pl.BlockSpec((H, H), wfull),
            pl.BlockSpec((1, H), wfull),
            pl.BlockSpec((H, H), wfull),
        ],
        out_specs=pl.BlockSpec((1, ct, H), lambda b, c: (b, c, 0)),
        out_shape=jax.ShapeDtypeStruct((B, T, H), dt),
        scratch_shapes=[pltpu.VMEM((num_heads, head_i, head_f), jnp.float32)],
        compiler_params=pltpu.CompilerParams(
            dimension_semantics=("parallel", "arbitrary"),
            vmem_limit_bytes=32 * 1024 * 1024),
    )(x, wq, wf, wi, gnw, wo)
    return y


# ----------------------------------------------------------------------------
# Pure-JAX reference (recurrent form) for the correctness check
# ----------------------------------------------------------------------------
def hgrn2_reference(x, params, *, num_heads, expand_ratio, eps=1e-5):
    B, T, H = x.shape
    head_f = expand_ratio
    head_i = H // num_heads

    q = x @ params["q_proj"].T
    f = x @ params["f_proj"].T
    i = x @ params["i_proj"].T
    q = q * jax.nn.sigmoid(q)
    g = jax.nn.log_sigmoid(f)
    k = 1.0 - jnp.exp(g)

    qh = q.reshape(B, T, num_heads, head_f)
    kh = k.reshape(B, T, num_heads, head_f)
    gh = g.reshape(B, T, num_heads, head_f)
    vh = i.reshape(B, T, num_heads, head_i)
    scale = head_f ** -0.5

    def step(S, inp):
        qt, kt, gt, vt = inp
        S = S * jnp.exp(gt)[..., None] + kt[..., None] * vt[..., None, :]
        ot = jnp.einsum("bhd,bhde->bhe", qt * scale, S)
        return S, ot

    S0 = jnp.zeros((B, num_heads, head_f, head_i), jnp.float32)
    _, o = lax.scan(step, S0, (qh.transpose(1, 0, 2, 3),
                               kh.transpose(1, 0, 2, 3),
                               gh.transpose(1, 0, 2, 3),
                               vh.transpose(1, 0, 2, 3)))
    o = o.transpose(1, 0, 2, 3).reshape(B, T, H)

    var = jnp.mean(o.astype(jnp.float32) ** 2, axis=-1, keepdims=True)
    on = o * lax.rsqrt(var + eps) * params["g_norm_weight"]
    return on @ params["o_proj"].T


if __name__ == "__main__":
    # Config consistent with the module: hidden_size=64, expand_ratio=16
    #   -> num_heads = 4, forget_dim = 64, head_f_dim = head_i_dim = 16
    B, T, H = 2, 8, 64
    expand_ratio = 16
    num_heads = H // expand_ratio
    forget_dim = num_heads * expand_ratio

    key = jax.random.PRNGKey(0)
    k_x, k_x2, k_q, k_f, k_i, k_o = jax.random.split(key, 6)

    x = jax.random.normal(k_x, (B, T, H), jnp.float32)
    params = {
        "q_proj": jax.random.normal(k_q, (forget_dim, H), jnp.float32) * 0.05,
        "f_proj": jax.random.normal(k_f, (forget_dim, H), jnp.float32) * 0.05,
        "i_proj": jax.random.normal(k_i, (H, H), jnp.float32) * 0.05,
        "o_proj": jax.random.normal(k_o, (H, H), jnp.float32) * 0.05,
        "g_norm_weight": jnp.ones((H,), jnp.float32),
    }

    # 1) default (f32-exact) path, single time chunk
    out = hgrn2_attention_forward(x, params, num_heads=num_heads,
                                  expand_ratio=expand_ratio)
    out = jax.block_until_ready(out)
    ref = hgrn2_reference(x, params, num_heads=num_heads,
                          expand_ratio=expand_ratio)
    assert out.shape == (B, T, H)
    err = float(jnp.max(jnp.abs(out - ref)))
    assert jnp.allclose(out, ref, atol=2e-3, rtol=2e-3), f"f32 mismatch: {err}"

    # 2) multi-chunk path (GLA state carried across time chunks in VMEM scratch)
    T2 = 32
    x2 = jax.random.normal(k_x2, (B, T2, H), jnp.float32)
    out2 = jax.block_until_ready(
        hgrn2_attention_forward(x2, params, num_heads=num_heads,
                                expand_ratio=expand_ratio, chunk_size=8))
    ref2 = hgrn2_reference(x2, params, num_heads=num_heads,
                           expand_ratio=expand_ratio)
    err2 = float(jnp.max(jnp.abs(out2 - ref2)))
    assert jnp.allclose(out2, ref2, atol=2e-3, rtol=2e-3), f"chunk mismatch: {err2}"

    # 3) bf16-MXU path (performance configuration), f32 accumulation
    out_bf = jax.block_until_ready(
        hgrn2_attention_forward(x, params, num_heads=num_heads,
                                expand_ratio=expand_ratio,
                                mxu_dtype=jnp.bfloat16))
    err_bf = float(jnp.max(jnp.abs(out_bf - ref)))
    assert jnp.allclose(out_bf, ref, atol=1e-1, rtol=1e-1), f"bf16 mismatch: {err_bf}"

    print("KERNEL_OK")
</pallas_src>

<mosaic_0001>
module attributes {stable_mosaic.version = 11 : i64} {
  func.func @_hgrn2_fused_kernel(%arg0: i32, %arg1: i32, %arg2: memref<1x8x64xf32, #tpu.memory_space<vmem>>, %arg3: memref<64x64xf32, #tpu.memory_space<vmem>>, %arg4: memref<64x64xf32, #tpu.memory_space<vmem>>, %arg5: memref<64x64xf32, #tpu.memory_space<vmem>>, %arg6: memref<1x64xf32, #tpu.memory_space<vmem>>, %arg7: memref<64x64xf32, #tpu.memory_space<vmem>>, %arg8: memref<1x8x64xf32, #tpu.memory_space<vmem>>, %arg9: memref<4x16x16xf32, #tpu.memory_space<vmem>>) attributes {dimension_semantics = [#tpu.dimension_semantics<parallel>, #tpu.dimension_semantics<arbitrary>], iteration_bounds = array<i64: 2, 1>, scalar_prefetch = 0 : i64, scratch_operands = 1 : i64, tpu.core_type = #tpu.core_type<tc>, window_params = [{transform_indices = @transform_0, window_bounds = array<i64: 1, 8, 64>}, {pipeline_mode = #tpu.pipeline_mode<synchronous>, transform_indices = @transform_1, window_bounds = array<i64: 64, 64>}, {pipeline_mode = #tpu.pipeline_mode<synchronous>, transform_indices = @transform_2, window_bounds = array<i64: 64, 64>}, {pipeline_mode = #tpu.pipeline_mode<synchronous>, transform_indices = @transform_3, window_bounds = array<i64: 64, 64>}, {pipeline_mode = #tpu.pipeline_mode<synchronous>, transform_indices = @transform_4, window_bounds = array<i64: 1, 64>}, {pipeline_mode = #tpu.pipeline_mode<synchronous>, transform_indices = @transform_5, window_bounds = array<i64: 64, 64>}, {transform_indices = @transform_6, window_bounds = array<i64: 1, 8, 64>}]} {
    %c0_i32 = arith.constant 0 : i32
    %0 = arith.cmpi eq, %arg1, %c0_i32 : i32
    %1 = arith.extui %0 : i1 to i32
    %c0_i32_0 = arith.constant 0 : i32
    %2 = arith.cmpi ne, %1, %c0_i32_0 : i32
    scf.if %2 {
      %cst_59 = arith.constant 0.000000e+00 : f32
      %114 = vector.broadcast %cst_59 : f32 to vector<4x16x16xf32>
      %c0_60 = arith.constant 0 : index
      %c0_61 = arith.constant 0 : index
      %c0_62 = arith.constant 0 : index
      %115 = vector.load %arg9[%c0_60, %c0_61, %c0_62] : memref<4x16x16xf32, #tpu.memory_space<vmem>>, vector<4x16x16xf32>
      tpu.vector_store %arg9[%c0_60, %c0_61, %c0_62], %114 {strides = array<i32>} : memref<4x16x16xf32, #tpu.memory_space<vmem>>, vector<4x16x16xf32>,
    } else {
    }
    %c0 = arith.constant 0 : index
    %c0_1 = arith.constant 0 : index
    %c0_2 = arith.constant 0 : index
    %3 = vector.load %arg2[%c0, %c0_1, %c0_2] : memref<1x8x64xf32, #tpu.memory_space<vmem>>, vector<1x8x64xf32>
    %4 = vector.shape_cast %3 : vector<1x8x64xf32> to vector<8x64xf32>
    %c0_3 = arith.constant 0 : index
    %c0_4 = arith.constant 0 : index
    %5 = vector.load %arg3[%c0_3, %c0_4] : memref<64x64xf32, #tpu.memory_space<vmem>>, vector<64x64xf32>
    %cst = arith.constant dense<0.000000e+00> : vector<8x64xf32>
    %6 = tpu.matmul %4, %5, %cst {dimension_numbers = #tpu.dot_dimension_numbers<[1], [0], [0], [1], [0, 0, 1, 1], [], []>} : vector<8x64xf32>, vector<64x64xf32>, vector<8x64xf32> -> vector<8x64xf32>
    %c0_5 = arith.constant 0 : index
    %c0_6 = arith.constant 0 : index
    %7 = vector.load %arg4[%c0_5, %c0_6] : memref<64x64xf32, #tpu.memory_space<vmem>>, vector<64x64xf32>
    %cst_7 = arith.constant dense<0.000000e+00> : vector<8x64xf32>
    %8 = tpu.matmul %4, %7, %cst_7 {dimension_numbers = #tpu.dot_dimension_numbers<[1], [0], [0], [1], [0, 0, 1, 1], [], []>} : vector<8x64xf32>, vector<64x64xf32>, vector<8x64xf32> -> vector<8x64xf32>
    %c0_8 = arith.constant 0 : index
    %c0_9 = arith.constant 0 : index
    %9 = vector.load %arg5[%c0_8, %c0_9] : memref<64x64xf32, #tpu.memory_space<vmem>>, vector<64x64xf32>
    %cst_10 = arith.constant dense<0.000000e+00> : vector<8x64xf32>
    %10 = tpu.matmul %4, %9, %cst_10 {dimension_numbers = #tpu.dot_dimension_numbers<[1], [0], [0], [1], [0, 0, 1, 1], [], []>} : vector<8x64xf32>, vector<64x64xf32>, vector<8x64xf32> -> vector<8x64xf32>
    %cst_11 = arith.constant 0.000000e+00 : f32
    %11 = vector.broadcast %cst_11 : f32 to vector<8x64xf32>
    %12 = arith.subf %11, %6 : vector<8x64xf32>
    %13 = math.exp %12 : vector<8x64xf32>
    %cst_12 = arith.constant 1.000000e+00 : f32
    %14 = vector.broadcast %cst_12 : f32 to vector<8x64xf32>
    %15 = arith.addf %14, %13 : vector<8x64xf32>
    %cst_13 = arith.constant 1.000000e+00 : f32
    %16 = vector.broadcast %cst_13 : f32 to vector<8x64xf32>
    %17 = arith.divf %16, %15 : vector<8x64xf32>
    %18 = arith.mulf %6, %17 : vector<8x64xf32>
    %cst_14 = arith.constant 0.000000e+00 : f32
    %19 = vector.broadcast %cst_14 : f32 to vector<8x64xf32>
    %20 = arith.minimumf %8, %19 : vector<8x64xf32>
    %21 = math.absf %8 : vector<8x64xf32>
    %cst_15 = arith.constant 0.000000e+00 : f32
    %22 = vector.broadcast %cst_15 : f32 to vector<8x64xf32>
    %23 = arith.subf %22, %21 : vector<8x64xf32>
    %24 = math.exp %23 : vector<8x64xf32>
    %25 = math.log1p %24 : vector<8x64xf32>
    %26 = arith.subf %20, %25 : vector<8x64xf32>
    %27 = math.exp %8 : vector<8x64xf32>
    %cst_16 = arith.constant 1.000000e+00 : f32
    %28 = vector.broadcast %cst_16 : f32 to vector<8x64xf32>
    %29 = arith.addf %28, %27 : vector<8x64xf32>
    %cst_17 = arith.constant 1.000000e+00 : f32
    %30 = vector.broadcast %cst_17 : f32 to vector<8x64xf32>
    %31 = arith.divf %30, %29 : vector<8x64xf32>
    %32 = tpu.iota {dimensions = array<i32: 0>} : vector<8x8xi32>
    %33 = tpu.iota {dimensions = array<i32: 1>} : vector<8x8xi32>
    %34 = arith.cmpi sge, %32, %33 : vector<8x8xi32>
    %35 = arith.extui %34 : vector<8x8xi1> to vector<8x8xi32>
    %36 = arith.sitofp %35 : vector<8x8xi32> to vector<8x8xf32>
    %cst_18 = arith.constant dense<0.000000e+00> : vector<8x64xf32>
    %37 = tpu.matmul %36, %26, %cst_18 {dimension_numbers = #tpu.dot_dimension_numbers<[1], [0], [0], [1], [0, 0, 1, 1], [], []>} : vector<8x8xf32>, vector<8x64xf32>, vector<8x64xf32> -> vector<8x64xf32>
    %38 = vector.extract_strided_slice %37 {offsets = [7, 0], sizes = [1, 64], strides = [1, 1]} : vector<8x64xf32> to vector<1x64xf32>
    %39 = math.exp %37 : vector<8x64xf32>
    %40 = arith.mulf %18, %39 : vector<8x64xf32>
    %cst_19 = arith.constant 2.500000e-01 : f32
    %41 = vector.broadcast %cst_19 : f32 to vector<8x64xf32>
    %42 = arith.mulf %40, %41 : vector<8x64xf32>
    %cst_20 = arith.constant 0.000000e+00 : f32
    %43 = vector.broadcast %cst_20 : f32 to vector<8x64xf32>
    %44 = arith.subf %43, %37 : vector<8x64xf32>
    %45 = math.exp %44 : vector<8x64xf32>
    %46 = arith.mulf %31, %45 : vector<8x64xf32>
    %47 = vector.extract_strided_slice %42 {offsets = [0, 0], sizes = [8, 16], strides = [1, 1]} : vector<8x64xf32> to vector<8x16xf32>
    %48 = vector.extract_strided_slice %46 {offsets = [0, 0], sizes = [8, 16], strides = [1, 1]} : vector<8x64xf32> to vector<8x16xf32>
    %49 = vector.extract_strided_slice %10 {offsets = [0, 0], sizes = [8, 16], strides = [1, 1]} : vector<8x64xf32> to vector<8x16xf32>
    %c0_21 = arith.constant 0 : index
    %c0_22 = arith.constant 0 : index
    %c0_23 = arith.constant 0 : index
    %50 = vector.load %arg9[%c0_21, %c0_22, %c0_23] : memref<4x16x16xf32, #tpu.memory_space<vmem>>, vector<1x16x16xf32>
    %51 = vector.shape_cast %50 : vector<1x16x16xf32> to vector<16x16xf32>
    %cst_24 = arith.constant dense<0.000000e+00> : vector<8x8xf32>
    %52 = tpu.matmul %47, %48, %cst_24 {dimension_numbers = #tpu.dot_dimension_numbers<[1], [1], [0], [0], [0, 0, 1, 0], [], []>} : vector<8x16xf32>, vector<8x16xf32>, vector<8x8xf32> -> vector<8x8xf32>
    %cst_25 = arith.constant 0.000000e+00 : f32
    %53 = vector.broadcast %cst_25 : f32 to vector<8x8xf32>
    %54 = arith.select %34, %52, %53 : vector<8x8xi1>, vector<8x8xf32>
    %cst_26 = arith.constant dense<0.000000e+00> : vector<8x16xf32>
    %55 = tpu.matmul %54, %49, %cst_26 {dimension_numbers = #tpu.dot_dimension_numbers<[1], [0], [0], [1], [0, 0, 1, 1], [], []>} : vector<8x8xf32>, vector<8x16xf32>, vector<8x16xf32> -> vector<8x16xf32>
    %cst_27 = arith.constant dense<0.000000e+00> : vector<8x16xf32>
    %56 = tpu.matmul %47, %51, %cst_27 {dimension_numbers = #tpu.dot_dimension_numbers<[1], [1], [0], [0], [0, 0, 1, 0], [], []>} : vector<8x16xf32>, vector<16x16xf32>, vector<8x16xf32> -> vector<8x16xf32>
    %57 = arith.addf %55, %56 : vector<8x16xf32>
    %58 = vector.extract_strided_slice %42 {offsets = [0, 16], sizes = [8, 16], strides = [1, 1]} : vector<8x64xf32> to vector<8x16xf32>
    %59 = vector.extract_strided_slice %46 {offsets = [0, 16], sizes = [8, 16], strides = [1, 1]} : vector<8x64xf32> to vector<8x16xf32>
    %60 = vector.extract_strided_slice %10 {offsets = [0, 16], sizes = [8, 16], strides = [1, 1]} : vector<8x64xf32> to vector<8x16xf32>
    %c1 = arith.constant 1 : index
    %c0_28 = arith.constant 0 : index
    %c0_29 = arith.constant 0 : index
    %61 = vector.load %arg9[%c1, %c0_28, %c0_29] : memref<4x16x16xf32, #tpu.memory_space<vmem>>, vector<1x16x16xf32>
    %62 = vector.shape_cast %61 : vector<1x16x16xf32> to vector<16x16xf32>
    %cst_30 = arith.constant dense<0.000000e+00> : vector<8x8xf32>
    %63 = tpu.matmul %58, %59, %cst_30 {dimension_numbers = #tpu.dot_dimension_numbers<[1], [1], [0], [0], [0, 0, 1, 0], [], []>} : vector<8x16xf32>, vector<8x16xf32>, vector<8x8xf32> -> vector<8x8xf32>
    %cst_31 = arith.constant 0.000000e+00 : f32
    %64 = vector.broadcast %cst_31 : f32 to vector<8x8xf32>
    %65 = arith.select %34, %63, %64 : vector<8x8xi1>, vector<8x8xf32>
    %cst_32 = arith.constant dense<0.000000e+00> : vector<8x16xf32>
    %66 = tpu.matmul %65, %60, %cst_32 {dimension_numbers = #tpu.dot_dimension_numbers<[1], [0], [0], [1], [0, 0, 1, 1], [], []>} : vector<8x8xf32>, vector<8x16xf32>, vector<8x16xf32> -> vector<8x16xf32>
    %cst_33 = arith.constant dense<0.000000e+00> : vector<8x16xf32>
    %67 = tpu.matmul %58, %62, %cst_33 {dimension_numbers = #tpu.dot_dimension_numbers<[1], [1], [0], [0], [0, 0, 1, 0], [], []>} : vector<8x16xf32>, vector<16x16xf32>, vector<8x16xf32> -> vector<8x16xf32>
    %68 = arith.addf %66, %67 : vector<8x16xf32>
    %69 = vector.extract_strided_slice %42 {offsets = [0, 32], sizes = [8, 16], strides = [1, 1]} : vector<8x64xf32> to vector<8x16xf32>
    %70 = vector.extract_strided_slice %46 {offsets = [0, 32], sizes = [8, 16], strides = [1, 1]} : vector<8x64xf32> to vector<8x16xf32>
    %71 = vector.extract_strided_slice %10 {offsets = [0, 32], sizes = [8, 16], strides = [1, 1]} : vector<8x64xf32> to vector<8x16xf32>
    %c2 = arith.constant 2 : index
    %c0_34 = arith.constant 0 : index
    %c0_35 = arith.constant 0 : index
    %72 = vector.load %arg9[%c2, %c0_34, %c0_35] : memref<4x16x16xf32, #tpu.memory_space<vmem>>, vector<1x16x16xf32>
    %73 = vector.shape_cast %72 : vector<1x16x16xf32> to vector<16x16xf32>
    %cst_36 = arith.constant dense<0.000000e+00> : vector<8x8xf32>
    %74 = tpu.matmul %69, %70, %cst_36 {dimension_numbers = #tpu.dot_dimension_numbers<[1], [1], [0], [0], [0, 0, 1, 0], [], []>} : vector<8x16xf32>, vector<8x16xf32>, vector<8x8xf32> -> vector<8x8xf32>
    %cst_37 = arith.constant 0.000000e+00 : f32
    %75 = vector.broadcast %cst_37 : f32 to vector<8x8xf32>
    %76 = arith.select %34, %74, %75 : vector<8x8xi1>, vector<8x8xf32>
    %cst_38 = arith.constant dense<0.000000e+00> : vector<8x16xf32>
    %77 = tpu.matmul %76, %71, %cst_38 {dimension_numbers = #tpu.dot_dimension_numbers<[1], [0], [0], [1], [0, 0, 1, 1], [], []>} : vector<8x8xf32>, vector<8x16xf32>, vector<8x16xf32> -> vector<8x16xf32>
    %cst_39 = arith.constant dense<0.000000e+00> : vector<8x16xf32>
    %78 = tpu.matmul %69, %73, %cst_39 {dimension_numbers = #tpu.dot_dimension_numbers<[1], [1], [0], [0], [0, 0, 1, 0], [], []>} : vector<8x16xf32>, vector<16x16xf32>, vector<8x16xf32> -> vector<8x16xf32>
    %79 = arith.addf %77, %78 : vector<8x16xf32>
    %80 = vector.extract_strided_slice %42 {offsets = [0, 48], sizes = [8, 16], strides = [1, 1]} : vector<8x64xf32> to vector<8x16xf32>
    %81 = vector.extract_strided_slice %46 {offsets = [0, 48], sizes = [8, 16], strides = [1, 1]} : vector<8x64xf32> to vector<8x16xf32>
    %82 = vector.extract_strided_slice %10 {offsets = [0, 48], sizes = [8, 16], strides = [1, 1]} : vector<8x64xf32> to vector<8x16xf32>
    %c3 = arith.constant 3 : index
    %c0_40 = arith.constant 0 : index
    %c0_41 = arith.constant 0 : index
    %83 = vector.load %arg9[%c3, %c0_40, %c0_41] : memref<4x16x16xf32, #tpu.memory_space<vmem>>, vector<1x16x16xf32>
    %84 = vector.shape_cast %83 : vector<1x16x16xf32> to vector<16x16xf32>
    %cst_42 = arith.constant dense<0.000000e+00> : vector<8x8xf32>
    %85 = tpu.matmul %80, %81, %cst_42 {dimension_numbers = #tpu.dot_dimension_numbers<[1], [1], [0], [0], [0, 0, 1, 0], [], []>} : vector<8x16xf32>, vector<8x16xf32>, vector<8x8xf32> -> vector<8x8xf32>
    %cst_43 = arith.constant 0.000000e+00 : f32
    %86 = vector.broadcast %cst_43 : f32 to vector<8x8xf32>
    %87 = arith.select %34, %85, %86 : vector<8x8xi1>, vector<8x8xf32>
    %cst_44 = arith.constant dense<0.000000e+00> : vector<8x16xf32>
    %88 = tpu.matmul %87, %82, %cst_44 {dimension_numbers = #tpu.dot_dimension_numbers<[1], [0], [0], [1], [0, 0, 1, 1], [], []>} : vector<8x8xf32>, vector<8x16xf32>, vector<8x16xf32> -> vector<8x16xf32>
    %cst_45 = arith.constant dense<0.000000e+00> : vector<8x16xf32>
    %89 = tpu.matmul %80, %84, %cst_45 {dimension_numbers = #tpu.dot_dimension_numbers<[1], [1], [0], [0], [0, 0, 1, 0], [], []>} : vector<8x16xf32>, vector<16x16xf32>, vector<8x16xf32> -> vector<8x16xf32>
    %90 = arith.addf %88, %89 : vector<8x16xf32>
    %91 = tpu.concatenate %57, %68, %79, %90 in 1 : vector<8x16xf32>, vector<8x16xf32>, vector<8x16xf32>, vector<8x16xf32> -> vector<8x64xf32>
    %c1_i32 = arith.constant 1 : i32
    %92 = arith.addi %arg1, %c1_i32 : i32
    %c1_i32_46 = arith.constant 1 : i32
    %93 = arith.cmpi slt, %92, %c1_i32_46 : i32
    %94 = arith.extui %93 : i1 to i32
    %c0_i32_47 = arith.constant 0 : i32
    %95 = arith.cmpi ne, %94, %c0_i32_47 : i32
    scf.if %95 {
      %114 = math.exp %38 : vector<1x64xf32>
      %115 = vector.broadcast %38 : vector<1x64xf32> to vector<8x64xf32>
      %116 = arith.subf %115, %37 : vector<8x64xf32>
      %117 = math.exp %116 : vector<8x64xf32>
      %118 = arith.mulf %31, %117 : vector<8x64xf32>
      %119 = vector.extract_strided_slice %10 {offsets = [0, 0], sizes = [8, 16], strides = [1, 1]} : vector<8x64xf32> to vector<8x16xf32>
      %120 = vector.extract_strided_slice %118 {offsets = [0, 0], sizes = [8, 16], strides = [1, 1]} : vector<8x64xf32> to vector<8x16xf32>
      %cst_59 = arith.constant dense<0.000000e+00> : vector<16x16xf32>
      %121 = tpu.matmul %119, %120, %cst_59 {dimension_numbers = #tpu.dot_dimension_numbers<[0], [0], [1], [1], [0, 1, 1, 1], [], []>} : vector<8x16xf32>, vector<8x16xf32>, vector<16x16xf32> -> vector<16x16xf32>
      %c0_60 = arith.constant 0 : index
      %c0_61 = arith.constant 0 : index
      %c0_62 = arith.constant 0 : index
      %122 = vector.load %arg9[%c0_60, %c0_61, %c0_62] : memref<4x16x16xf32, #tpu.memory_space<vmem>>, vector<1x16x16xf32>
      %123 = vector.shape_cast %122 : vector<1x16x16xf32> to vector<16x16xf32>
      %124 = vector.extract_strided_slice %114 {offsets = [0, 0], sizes = [1, 16], strides = [1, 1]} : vector<1x64xf32> to vector<1x16xf32>
      %125 = vector.broadcast %124 : vector<1x16xf32> to vector<16x16xf32>
      %126 = arith.mulf %123, %125 : vector<16x16xf32>
      %127 = arith.addf %126, %121 : vector<16x16xf32>
      %c0_63 = arith.constant 0 : index
      %c0_64 = arith.constant 0 : index
      %c0_65 = arith.constant 0 : index
      %128 = vector.load %arg9[%c0_63, %c0_64, %c0_65] : memref<4x16x16xf32, #tpu.memory_space<vmem>>, vector<1x16x16xf32>
      %129 = vector.shape_cast %128 : vector<1x16x16xf32> to vector<16x16xf32>
      %130 = vector.shape_cast %127 : vector<16x16xf32> to vector<1x16x16xf32>
      tpu.vector_store %arg9[%c0_63, %c0_64, %c0_65], %130 {strides = array<i32>} : memref<4x16x16xf32, #tpu.memory_space<vmem>>, vector<1x16x16xf32>,
      %131 = vector.extract_strided_slice %10 {offsets = [0, 16], sizes = [8, 16], strides = [1, 1]} : vector<8x64xf32> to vector<8x16xf32>
      %132 = vector.extract_strided_slice %118 {offsets = [0, 16], sizes = [8, 16], strides = [1, 1]} : vector<8x64xf32> to vector<8x16xf32>
      %cst_66 = arith.constant dense<0.000000e+00> : vector<16x16xf32>
      %133 = tpu.matmul %131, %132, %cst_66 {dimension_numbers = #tpu.dot_dimension_numbers<[0], [0], [1], [1], [0, 1, 1, 1], [], []>} : vector<8x16xf32>, vector<8x16xf32>, vector<16x16xf32> -> vector<16x16xf32>
      %c1_67 = arith.constant 1 : index
      %c0_68 = arith.constant 0 : index
      %c0_69 = arith.constant 0 : index
      %134 = vector.load %arg9[%c1_67, %c0_68, %c0_69] : memref<4x16x16xf32, #tpu.memory_space<vmem>>, vector<1x16x16xf32>
      %135 = vector.shape_cast %134 : vector<1x16x16xf32> to vector<16x16xf32>
      %136 = vector.extract_strided_slice %114 {offsets = [0, 16], sizes = [1, 16], strides = [1, 1]} : vector<1x64xf32> to vector<1x16xf32>
      %137 = vector.broadcast %136 : vector<1x16xf32> to vector<16x16xf32>
      %138 = arith.mulf %135, %137 : vector<16x16xf32>
      %139 = arith.addf %138, %133 : vector<16x16xf32>
      %c1_70 = arith.constant 1 : index
      %c0_71 = arith.constant 0 : index
      %c0_72 = arith.constant 0 : index
      %140 = vector.load %arg9[%c1_70, %c0_71, %c0_72] : memref<4x16x16xf32, #tpu.memory_space<vmem>>, vector<1x16x16xf32>
      %141 = vector.shape_cast %140 : vector<1x16x16xf32> to vector<16x16xf32>
      %142 = vector.shape_cast %139 : vector<16x16xf32> to vector<1x16x16xf32>
      tpu.vector_store %arg9[%c1_70, %c0_71, %c0_72], %142 {strides = array<i32>} : memref<4x16x16xf32, #tpu.memory_space<vmem>>, vector<1x16x16xf32>,
      %143 = vector.extract_strided_slice %10 {offsets = [0, 32], sizes = [8, 16], strides = [1, 1]} : vector<8x64xf32> to vector<8x16xf32>
      %144 = vector.extract_strided_slice %118 {offsets = [0, 32], sizes = [8, 16], strides = [1, 1]} : vector<8x64xf32> to vector<8x16xf32>
      %cst_73 = arith.constant dense<0.000000e+00> : vector<16x16xf32>
      %145 = tpu.matmul %143, %144, %cst_73 {dimension_numbers = #tpu.dot_dimension_numbers<[0], [0], [1], [1], [0, 1, 1, 1], [], []>} : vector<8x16xf32>, vector<8x16xf32>, vector<16x16xf32> -> vector<16x16xf32>
      %c2_74 = arith.constant 2 : index
      %c0_75 = arith.constant 0 : index
      %c0_76 = arith.constant 0 : index
      %146 = vector.load %arg9[%c2_74, %c0_75, %c0_76] : memref<4x16x16xf32, #tpu.memory_space<vmem>>, vector<1x16x16xf32>
      %147 = vector.shape_cast %146 : vector<1x16x16xf32> to vector<16x16xf32>
      %148 = vector.extract_strided_slice %114 {offsets = [0, 32], sizes = [1, 16], strides = [1, 1]} : vector<1x64xf32> to vector<1x16xf32>
      %149 = vector.broadcast %148 : vector<1x16xf32> to vector<16x16xf32>
      %150 = arith.mulf %147, %149 : vector<16x16xf32>
      %151 = arith.addf %150, %145 : vector<16x16xf32>
      %c2_77 = arith.constant 2 : index
      %c0_78 = arith.constant 0 : index
      %c0_79 = arith.constant 0 : index
      %152 = vector.load %arg9[%c2_77, %c0_78, %c0_79] : memref<4x16x16xf32, #tpu.memory_space<vmem>>, vector<1x16x16xf32>
      %153 = vector.shape_cast %152 : vector<1x16x16xf32> to vector<16x16xf32>
      %154 = vector.shape_cast %151 : vector<16x16xf32> to vector<1x16x16xf32>
      tpu.vector_store %arg9[%c2_77, %c0_78, %c0_79], %154 {strides = array<i32>} : memref<4x16x16xf32, #tpu.memory_space<vmem>>, vector<1x16x16xf32>,
      %155 = vector.extract_strided_slice %10 {offsets = [0, 48], sizes = [8, 16], strides = [1, 1]} : vector<8x64xf32> to vector<8x16xf32>
      %156 = vector.extract_strided_slice %118 {offsets = [0, 48], sizes = [8, 16], strides = [1, 1]} : vector<8x64xf32> to vector<8x16xf32>
      %cst_80 = arith.constant dense<0.000000e+00> : vector<16x16xf32>
      %157 = tpu.matmul %155, %156, %cst_80 {dimension_numbers = #tpu.dot_dimension_numbers<[0], [0], [1], [1], [0, 1, 1, 1], [], []>} : vector<8x16xf32>, vector<8x16xf32>, vector<16x16xf32> -> vector<16x16xf32>
      %c3_81 = arith.constant 3 : index
      %c0_82 = arith.constant 0 : index
      %c0_83 = arith.constant 0 : index
      %158 = vector.load %arg9[%c3_81, %c0_82, %c0_83] : memref<4x16x16xf32, #tpu.memory_space<vmem>>, vector<1x16x16xf32>
      %159 = vector.shape_cast %158 : vector<1x16x16xf32> to vector<16x16xf32>
      %160 = vector.extract_strided_slice %114 {offsets = [0, 48], sizes = [1, 16], strides = [1, 1]} : vector<1x64xf32> to vector<1x16xf32>
      %161 = vector.broadcast %160 : vector<1x16xf32> to vector<16x16xf32>
      %162 = arith.mulf %159, %161 : vector<16x16xf32>
      %163 = arith.addf %162, %157 : vector<16x16xf32>
      %c3_84 = arith.constant 3 : index
      %c0_85 = arith.constant 0 : index
      %c0_86 = arith.constant 0 : index
      %164 = vector.load %arg9[%c3_84, %c0_85, %c0_86] : memref<4x16x16xf32, #tpu.memory_space<vmem>>, vector<1x16x16xf32>
      %165 = vector.shape_cast %164 : vector<1x16x16xf32> to vector<16x16xf32>
      %166 = vector.shape_cast %163 : vector<16x16xf32> to vector<1x16x16xf32>
      tpu.vector_store %arg9[%c3_84, %c0_85, %c0_86], %166 {strides = array<i32>} : memref<4x16x16xf32, #tpu.memory_space<vmem>>, vector<1x16x16xf32>,
    } else {
    }
    %96 = arith.mulf %91, %91 : vector<8x64xf32>
    %cst_48 = arith.constant dense<0.000000e+00> : vector<8xf32>
    %97 = vector.multi_reduction <add>, %96, %cst_48 [1] : vector<8x64xf32> to vector<8xf32>
    %98 = vector.shape_cast %97 : vector<8xf32> to vector<8x1xf32>
    %cst_49 = arith.constant 6.400000e+01 : f32
    %99 = vector.broadcast %cst_49 : f32 to vector<8x1xf32>
    %100 = arith.divf %98, %99 : vector<8x1xf32>
    %cst_50 = arith.constant 9.99999974E-6 : f32
    %101 = vector.broadcast %cst_50 : f32 to vector<8x1xf32>
    %102 = arith.addf %100, %101 : vector<8x1xf32>
    %103 = math.rsqrt %102 : vector<8x1xf32>
    %104 = vector.broadcast %103 : vector<8x1xf32> to vector<8x64xf32>
    %105 = arith.mulf %91, %104 : vector<8x64xf32>
    %c0_51 = arith.constant 0 : index
    %c0_52 = arith.constant 0 : index
    %106 = vector.load %arg6[%c0_51, %c0_52] : memref<1x64xf32, #tpu.memory_space<vmem>>, vector<1x64xf32>
    %107 = vector.broadcast %106 : vector<1x64xf32> to vector<8x64xf32>
    %108 = arith.mulf %105, %107 : vector<8x64xf32>
    %c0_53 = arith.constant 0 : index
    %c0_54 = arith.constant 0 : index
    %109 = vector.load %arg7[%c0_53, %c0_54] : memref<64x64xf32, #tpu.memory_space<vmem>>, vector<64x64xf32>
    %cst_55 = arith.constant dense<0.000000e+00> : vector<8x64xf32>
    %110 = tpu.matmul %108, %109, %cst_55 {dimension_numbers = #tpu.dot_dimension_numbers<[1], [0], [0], [1], [0, 0, 1, 1], [], []>} : vector<8x64xf32>, vector<64x64xf32>, vector<8x64xf32> -> vector<8x64xf32>
    %c0_56 = arith.constant 0 : index
    %c0_57 = arith.constant 0 : index
    %c0_58 = arith.constant 0 : index
    %111 = vector.load %arg8[%c0_56, %c0_57, %c0_58] : memref<1x8x64xf32, #tpu.memory_space<vmem>>, vector<1x8x64xf32>
    %112 = vector.shape_cast %111 : vector<1x8x64xf32> to vector<8x64xf32>
    %113 = vector.shape_cast %110 : vector<8x64xf32> to vector<1x8x64xf32>
    tpu.vector_store %arg8[%c0_56, %c0_57, %c0_58], %113 {strides = array<i32>} : memref<1x8x64xf32, #tpu.memory_space<vmem>>, vector<1x8x64xf32>,
    return
  }
  func.func @transform_0(%arg0: i32, %arg1: i32) -> (i32, i32, i32) {
    %c0_i32 = arith.constant 0 : i32
    %c0_i32_0 = arith.constant 0 : i32
    return %arg0, %arg1, %c0_i32 : i32, i32, i32
  }
  func.func @transform_1(%arg0: i32, %arg1: i32) -> (i32, i32) {
    %c0_i32 = arith.constant 0 : i32
    %c0_i32_0 = arith.constant 0 : i32
    %c0_i32_1 = arith.constant 0 : i32
    return %c0_i32, %c0_i32_0 : i32, i32
  }
  func.func @transform_2(%arg0: i32, %arg1: i32) -> (i32, i32) {
    %c0_i32 = arith.constant 0 : i32
    %c0_i32_0 = arith.constant 0 : i32
    %c0_i32_1 = arith.constant 0 : i32
    return %c0_i32, %c0_i32_0 : i32, i32
  }
  func.func @transform_3(%arg0: i32, %arg1: i32) -> (i32, i32) {
    %c0_i32 = arith.constant 0 : i32
    %c0_i32_0 = arith.constant 0 : i32
    %c0_i32_1 = arith.constant 0 : i32
    return %c0_i32, %c0_i32_0 : i32, i32
  }
  func.func @transform_4(%arg0: i32, %arg1: i32) -> (i32, i32) {
    %c0_i32 = arith.constant 0 : i32
    %c0_i32_0 = arith.constant 0 : i32
    %c0_i32_1 = arith.constant 0 : i32
    return %c0_i32, %c0_i32_0 : i32, i32
  }
  func.func @transform_5(%arg0: i32, %arg1: i32) -> (i32, i32) {
    %c0_i32 = arith.constant 0 : i32
    %c0_i32_0 = arith.constant 0 : i32
    %c0_i32_1 = arith.constant 0 : i32
    return %c0_i32, %c0_i32_0 : i32, i32
  }
  func.func @transform_6(%arg0: i32, %arg1: i32) -> (i32, i32, i32) {
    %c0_i32 = arith.constant 0 : i32
    %c0_i32_0 = arith.constant 0 : i32
    return %arg0, %arg1, %c0_i32 : i32, i32, i32
  }
}

</mosaic_0001>

<bundles_post_ra>
// kernel: tpu_custom_call.1
= control target key start
LH: loop header
LB: loop body
LE: loop exit
PB: predicated region body
PF: predicated region fallthrough
CT: control target
= control target key end

     0   :  { %11 = vsyncpa [#allocation4], 0  ;;  %s2121_s0 = inlined_call_operand.hbm [shape: f32[2,8,64], index: 0, kind: input, shape index: {}]   ;;  %s2122_s1 = inlined_call_operand.hbm [shape: f32[64,64], index: 1, kind: input, shape index: {}]   ;;  %s2123_s2 = inlined_call_operand.hbm [shape: f32[64,64], index: 2, kind: input, shape index: {}]   ;;  %s2124_s3 = inlined_call_operand.hbm [shape: f32[64,64], index: 3, kind: input, shape index: {}]   ;;  %s2125_s4 = inlined_call_operand.vmem [shape: f32[1,64], index: 4, kind: input, shape index: {}]   ;;  %s2126_s5 = inlined_call_operand.hbm [shape: f32[64,64], index: 5, kind: input, shape index: {}]   ;;  %s2127_s6 = inlined_call_operand.hbm [shape: f32[2,8,64], index: 6, kind: output, shape index: {}]  }
   0x1   :  { %13 = vsyncpa [#allocation4 + $0x1], 0 }
   0x2   :  { %14 = vsyncpa [#allocation7], 0 }
   0x3   :  { %15 = vsyncpa [#allocation10], 0 }
   0x4   :  { %16 = vsyncpa [#allocation5], 0 }
   0x5   :  { %18 = vsyncpa [#allocation5 + $0x1], 0  ;;  %s1882_s21 = smov 0   ;;  %s1884_s22 = smov 0  }
   0x6   :  { %s1886_s23 = smov 0   ;;  %s1888_s24 = smov 0  }
   0x7   :  { %s1890_s25 = smov 0   ;;  %s1892_s26 = smov 0  }
   0x8 LB: > { %s1398_s27 = sadd.s32 4294967295, %s1831_s26   ;;  %p1400_p0 = scmp.ge.s32.totalorder %s1831_s26, 1  ;;  %s1831_s26 = sphi %s1892_s26, %s24_s26   ;;  %s1827_s25 = sphi %s1890_s25, %s2140_s25   ;;  %s1823_s24 = sphi %s1888_s24, %s2139_s24   ;;  %s1819_s23 = sphi %s1886_s23, %s2138_s23   ;;  %s1815_s22 = sphi %s1884_s22, %s2137_s22   ;;  %s1811_s21 = sphi %s1882_s21, %s2136_s21  }
   0x9   : > { %p1916_p1 = scmp.eq.s32.totalorder %s1398_s27, 0  ;;  %p202_p2 = scmp.lt.s32.totalorder %s1831_s26, 3 }
   0xa   : > { %s213_s7 = sshll.u32 %s2122_s1, 4  ;;  %s1833_s9 = smov [#allocation6]   ;;  %s214_s7 = int_to_ptr.hbm [resolvable:$true] %s213_s7 }
   0xb   : > { %p1924_p3 = pnand %p1400_p0, %p202_p2  ;;  %s215_s10 = sshll.u32 %s1833_s9, 4  ;;  %s216_s10 = int_to_ptr.vmem [resolvable:$true] %s215_s10 }
   0xc   : > { %p1405_p6 = scmp.ge.s32.totalorder %s1831_s26, 2  ;;  %s241_s14 = sshll.u32 %s2124_s3, 4  ;;  %s242_s14 = int_to_ptr.hbm [resolvable:$true] %s241_s14 }
   0xd   : > { %p1477_p4 = pneg %p1924_p3  ;;  %s1834_s15 = smov 128  }
   0xe   : > { %s1835_s16 = smov 8   ;;  %s1836_s17 = smov [#allocation9]  }
   0xf   : > { %p1932_p5 = pnand %p1477_p4, %p1916_p1  ;;  %s243_s18 = sshll.u32 %s1836_s17, 4  ;;  %s244_s18 = int_to_ptr.vmem [resolvable:$true] %s243_s18 }
  0x10   : > { %s227_s29 = sshll.u32 %s2123_s2, 4  ;;  %s1838_s13 = smov [#allocation11]   ;;  %s228_s29 = int_to_ptr.hbm [resolvable:$true] %s227_s29 }
  0x11   : > { %1480 = dma.hbm_to_vmem [thread:$0]  (!%p1932_p5), %s214_s7, 1024, %s216_s10, [#allocation7], %s1834_s15, %s1834_s15, %s1835_s16  }
  0x12   : > { %1486 = dma.hbm_to_vmem [thread:$0]  (!%p1932_p5), %s242_s14, 1024, %s244_s18, [#allocation10], %s1834_s15, %s1834_s15, %s1835_s16  }
  0x13   : > { %s258_s7 = sshll.u32 %s2126_s5, 4  ;;  %s1837_s10 = smov [#allocation8]   ;;  %s259_s7 = int_to_ptr.hbm [resolvable:$true] %s258_s7 }
  0x14   : > { %s229_s12 = sshll.u32 %s1837_s10, 4  ;;  %s260_s17 = sshll.u32 %s1838_s13, 4  ;;  %s230_s12 = int_to_ptr.vmem [resolvable:$true] %s229_s12  ;;  %s261_s17 = int_to_ptr.vmem [resolvable:$true] %s260_s17 }
  0x15   : > { %1483 = dma.hbm_to_vmem [thread:$0]  (!%p1932_p5), %s228_s29, 1024, %s230_s12, [#allocation7], %s1834_s15, %s1834_s15, %s1835_s16  }
  0x16   : > { %1489 = dma.hbm_to_vmem [thread:$0]  (!%p1932_p5), %s259_s7, 1024, %s261_s17, [#allocation10], %s1834_s15, %s1834_s15, %s1835_s16  }
  0x17   : > { %s36_s14 = sadd.s32 1, %s1827_s25  ;;  %s1399_s18 = sadd.s32 4294967294, %s1831_s26  }
  0x18   : > { %p38_p7 = scmp.ge.s32.totalorder %s36_s14, 2  ;;  %s45_s19 = sadd.s32 1, %s1819_s23 }
  0x19   : > { %p52_p8 = scmp.ne.s32.totalorder %s1819_s23, %s1815_s22  ;;  %p53_p9 = scmp.eq.s32.totalorder %s1831_s26, 0 }
  0x1a   : > { %s2142_s14 = smov (%p38_p7, %s36_s14), 0  ;;  %p58_p10 = scmp.ne.s32.totalorder %s1815_s22, %s1811_s21 }
  0x1b   : > { %s40_s20 = ssub.s32 %s1827_s25, %s2142_s14  ;;  %p189_p11 = scmp.eq.s32.totalorder %s1398_s27, 1 }
  0x1c   : > { %p43_p12 = scmp.eq.s32.totalorder %s40_s20, 0  ;;  %p1970_p13 = por %p1916_p1, %p58_p10 }
  0x1d   : > { %p1974_p0 = por %p189_p11, %p52_p8  ;;  %p195_p2 = scmp.eq.s32.totalorder %s1399_s18, 1 }
  0x1e   : > { %s1979_s16 = scalar_select %p43_p12, %s1819_s23, %s45_s19  }
  0x1f   : > { %p54_p4 = por %p53_p9, %p52_p8  ;;  %p1981_p5 = por %p195_p2, %p58_p10 }
  0x20   : > { %s274_s30 = sand.u32 1, %s1819_s23   ;;  %s1407_s27 = sshll.u32 %s1827_s25, 3 }
  0x21   : > { %p1502_p7 = scmp.lt.s32.totalorder %s1831_s26, 2  ;;  %s1406_s9 = sshll.u32 %s274_s30, 3 }
  0x22   : > { %s283_s12 = scalar_lea.hbm %s2121_s0, %s1407_s27  ;;  %s278_s17 = scalar_lea.vmem [#allocation3], %s1406_s9 }
  0x23   : > { %s285_s13 = sshll.u32 %s283_s12, 4  ;;  %s287_s20 = sshll.u32 %s278_s17, 4  ;;  %s286_s13 = int_to_ptr.hbm [resolvable:$true] %s285_s13  ;;  %s288_s20 = int_to_ptr.vmem [resolvable:$true] %s287_s20 }
  0x24   : > { %p1491_p11 = pnand %p1502_p7, %p54_p4  ;;  %s275_s18 = scalar_lea.sflag [#allocation4], %s274_s30 }
  0x25   : > { %296 = sbr.rel (%p1924_p3) target bundleno = 1255 (0x4e7), region = 44  ;;  %s1994_s19 = sand.u32 (!%p1924_p3), 1, %s1815_s22  }
  0x26   : > { %1493 = dma.hbm_to_vmem [thread:$0]  (!%p1491_p11), %s286_s13, 128, %s288_s20, %s275_s18  }
  0x27   : > { %s1409_s7 = sshll.u32 (!%p1924_p3), %s1994_s19, 3  ;;  %s299_s27 = scalar_lea.sflag (!%p1924_p3), [#allocation4], %s1994_s19 }
  0x28   : > { %s2000_s9 = scalar_lea.vmem (!%p1924_p3), [#allocation3], %s1409_s7 }
  0x2a   : > { %1794 = dma.done.wait (%p1970_p13), %s299_s27, 128  }
  0x2b   : > { %1796 = vsyncadd (%p1970_p13), %s299_s27, 4294967168 }
  0x2c   : > { %1798 = dma.done.wait (%p1916_p1), [#allocation7], 2048  }
  0x2d   : > { %1800 = vsyncadd (%p1916_p1), [#allocation7], 4294965248 }
  0x2e   : > { %1802 = dma.done.wait (%p1916_p1), [#allocation10], 2048  }
  0x2f   : > { %1804 = vsyncadd (%p1916_p1), [#allocation10], 4294965248  ;;  %v405_v0 = vld [vmem:[#allocation8 + $0x38] sm:$0xff]  ;;  %v404_v1 = vld [vmem:[#allocation8 + $0x30] sm:$0xff]  ;;  %vm374_vm0 = vcmask 523264   ;;  %v507_v32 = vlaneseq  ;;  %v1839_v44 = vmov 0.0  }
  0x30   : > { %414 = vmatpush.msra.mxu1 %v405_v0  ;;  %v403_v2 = vld [vmem:[#allocation8 + $0x28] sm:$0xff]  ;;  %v373_v3 = vld [vmem:[#allocation6 + $0x38] sm:$0xff]  ;;  %v372_v4 = vld [vmem:[#allocation6 + $0x30] sm:$0xff]  ;;  %vm514_vm3 = vcmask 64512   ;;  %s1840_s28 = smov 112   ;;  %vm356_vm4 = vcmask 130048  }
  0x31   : > { %v402_v5 = vld [vmem:[#allocation8 + $0x20] sm:$0xff]  ;;  %386 = vmatpush.msra.mxu0 %v373_v3  ;;  %v371_v6 = vld [vmem:[#allocation6 + $0x28] sm:$0xff]  ;;  %v401_v7 = vld [vmem:[#allocation8 + $0x18] sm:$0xff]  ;;  %v508_v34 = vshrl.u32 %v507_v32, 7  ;;  %v510_v35 = vand.u32 127, %v507_v32  ;;  %357 = vst.msk [vmem:[#allocation2] sm:$0xff] %vm356_vm4, %v1839_v44 }
  0x32   : > { %415 = vmatpush.msra.mxu1 %v404_v1  ;;  %v370_v8 = vld [vmem:[#allocation6 + $0x20] sm:$0xff]  ;;  %v400_v9 = vld [vmem:[#allocation8 + $0x10] sm:$0xff]  ;;  %v369_v10 = vld [vmem:[#allocation6 + $0x18] sm:$0xff]  ;;  %358 = vst.msk [vmem:[#allocation2 + $0x8] sm:$0xff] %vm356_vm4, %v1839_v44  ;;  %s1841_s8 = smov 80   ;;  %s1842_s11 = smov 96  }
  0x33   : > { %387 = vmatpush.msra.mxu0 %v372_v4  ;;  %v399_v11 = vld [vmem:[#allocation8 + $0x8] sm:$0xff]  ;;  %v368_v12 = vld [vmem:[#allocation6 + $0x10] sm:$0xff]  ;;  %v398_v13 = vld [vmem:[#allocation8] sm:$0xff]  ;;  %vm2018_vm1 = vcmp.ge.s32.totalorder %v508_v34, %v510_v35  ;;  %359 = vst.msk [vmem:[#allocation2 + $0x10] sm:$0xff] %vm356_vm4, %v1839_v44  ;;  %s1843_s30 = smov 16   ;;  %s1844_s10 = smov 32  }
  0x34   : > { %416 = vmatpush.msra.mxu1 %v403_v2  ;;  %v365_v14 = vld [vmem:[%s2000_s9] sm:$0xff]  ;;  %v367_v15 = vld [vmem:[#allocation6 + $0x8] sm:$0xff]  ;;  %v366_v16 = vld [vmem:[#allocation6] sm:$0xff]  ;;  %v1418_v45 = vsel %vm2018_vm1, 1.0, %v1839_v44  ;;  %360 = vst.msk [vmem:[#allocation2 + $0x18] sm:$0xff] %vm356_vm4, %v1839_v44  ;;  %s1845_s12 = smov 48  }
  0x35   : > { %388 = vmatpush.msra.mxu0 %v371_v6  ;;  %v433_v17 = vld [vmem:[#allocation9 + $0x38] sm:$0xff]  ;;  %v432_v18 = vld [vmem:[#allocation9 + $0x30] sm:$0xff]  ;;  %v431_v19 = vld [vmem:[#allocation9 + $0x28] sm:$0xff]  ;;  %361 = vst.msk [vmem:[#allocation2 + $0x20] sm:$0xff] %vm356_vm4, %v1839_v44  ;;  %vm891_vm13 = vcmask 261120   ;;  %vm893_vm14 = vcmask 392192  }
  0x36   : > { %417 = vmatpush.msra.mxu1 %v402_v5  ;;  %442 = vmatpush.msra.mxu2 %v433_v17  ;;  %v430_v20 = vld [vmem:[#allocation9 + $0x20] sm:$0xff]  ;;  %v429_v21 = vld [vmem:[#allocation9 + $0x18] sm:$0xff]  ;;  %v428_v22 = vld [vmem:[#allocation9 + $0x10] sm:$0xff]  ;;  %362 = vst.msk [vmem:[#allocation2 + $0x28] sm:$0xff] %vm356_vm4, %v1839_v44  ;;  %s1454_s20 = sshll.u32 %s1823_s24, 3  ;;  %s1761_s17 = scalar_lea.hbm %s2127_s6, 16 }
  0x37   : > { %389 = vmatpush.msra.mxu0 %v370_v8  ;;  %v427_v23 = vld [vmem:[#allocation9 + $0x8] sm:$0xff]  ;;  %v426_v24 = vld [vmem:[#allocation9] sm:$0xff]  ;;  %363 = vst.msk [vmem:[#allocation2 + $0x30] sm:$0xff] %vm356_vm4, %v1839_v44  ;;  %s1275_s9 = scalar_lea.hbm %s2127_s6, %s1454_s20 }
  0x38   : > { %418 = vmatpush.msra.mxu1 %v401_v7  ;;  %443 = vmatpush.msra.mxu2 %v432_v18  ;;  %364 = vst.msk [vmem:[#allocation2 + $0x38] sm:$0xff] %vm356_vm4, %v1839_v44 }
  0x39   : > { %390 = vmatpush.msra.mxu0 %v369_v10 }
  0x3a   : > { %419 = vmatpush.msra.mxu1 %v400_v9  ;;  %444 = vmatpush.msra.mxu2 %v431_v19 }
  0x3b   : > { %391 = vmatpush.msra.mxu0 %v368_v12 }
  0x3c   : > { %420 = vmatpush.msra.mxu1 %v399_v11  ;;  %445 = vmatpush.msra.mxu2 %v430_v20  ;;  %v547_v20 = vld [vmem:[#allocation2 + $0x8] sm:$0xff] }
  0x3d   : > { %392 = vmatpush.msra.mxu0 %v367_v15 }
  0x3e   : > { %421 = vmatpush.msra.mxu1 %v398_v13  ;;  %446 = vmatpush.msra.mxu2 %v429_v21 }
  0x3f   : > { %1416 = vmatmul.msk.f32.vlgmr.msra.gmra.mxu1 %vm374_vm0, %v365_v14  ;;  %393 = vmatpush.msra.mxu0 %v366_v16 }
  0x40   : > { %1415 = vmatmul.msk.f32.vlgmr.msra.gmra.mxu0 %vm374_vm0, %v365_v14  ;;  %447 = vmatpush.msra.mxu2 %v428_v22  ;;  %v546_v22 = vld [vmem:[#allocation2] sm:$0xff] }
  0x42   : > { %448 = vmatpush.msra.mxu2 %v427_v23  ;;  %v627_v23 = vld [vmem:[#allocation2 + $0x18] sm:$0xff] }
  0x44   : > { %449 = vmatpush.msra.mxu2 %v426_v24  ;;  %v626_v24 = vld [vmem:[#allocation2 + $0x10] sm:$0xff] }
  0x45   : > { %1417 = vmatmul.msk.f32.vlgmr.msra.gmra.mxu2 %vm374_vm0, %v365_v14 }
  0xbc   : > { %v423_v25 = vpop.f32.mrf.mxu1 }
  0xbd   : > { %v475_v26 = vand.u32 2147483647, %v423_v25  ;;  %v474_v41 = vmin.f32 %v423_v25, 0.0  ;;  %v395_v46 = vpop.f32.mrf.mxu0  ;;  %v489_v49 = vmul.f32 1.442695, %v423_v25 }
  0xbe   : > { %v454_v47 = vsub.f32 0.0, %v395_v46 }
  0xbf   : > { %v476_v27 = vsub.f32 0.0, %v475_v26 }
  0xc0   : > { %v455_v48 = vmul.f32 1.442695, %v454_v47 }
  0xc1   : > { %v477_v28 = vmul.f32 1.442695, %v476_v27 }
  0xc3   : > { %1571 = vpow2.f32 %v477_v28 }
  0xc8   : > { %v2025_v51 = vpop.f32.mrf.mxu2 }
  0xc9   : > { %v1572_v29 = vpop.eup %1571  ;;  %684 = vrot.lane.b32.xlu1 %v2025_v51, %s1840_s28  ;;  %620 = vmatpush.msrb.mxu0 %v2025_v51 }
  0xca   : > { %v479_v30 = vadd.f32 1.0, %v1572_v29  ;;  %v482_v31 = vmul.f32 -0.5, %v1572_v29  ;;  %v485_v36 = vand.u32 2147483647, %v1572_v29 }
  0xcc   : > { %1573 = vlog2.f32 %v479_v30  ;;  %v483_v33 = vadd.f32 1.0, %v482_v31  ;;  %vm486_vm2 = vcmp.lt.f32.partialorder %v485_v36, 0.0004427343  ;;  %v711_v31 = vld [vmem:[#allocation2 + $0x20] sm:$0xff]  ;;  %v796_v36 = vld [vmem:[#allocation2 + $0x38] sm:$0xff] }
  0xcd   : > { %1575 = vpow2.f32 %v455_v48 }
  0xce   : > { %v484_v39 = vmul.f32 %v1572_v29, %v483_v33  ;;  %1577 = vpow2.f32 %v489_v49  ;;  %v712_v29 = vld [vmem:[#allocation2 + $0x28] sm:$0xff] }
  0xd2   : > { %v1574_v37 = vpop.eup %1573 }
  0xd3   : > { %v481_v38 = vmul.f32 0.6931472, %v1574_v37  ;;  %v1576_v50 = vpop.eup %1575 }
  0xd4   : > { %v457_v52 = vadd.f32 1.0, %v1576_v50  ;;  %v1578_v53 = vpop.eup %1577 }
  0xd5   : > { %v487_v42 = vsel %vm486_vm2, %v484_v39, %v481_v38  ;;  %v491_v54 = vadd.f32 1.0, %v1578_v53  ;;  %v795_v38 = vld [vmem:[#allocation2 + $0x30] sm:$0xff] }
  0xd6   : > { %v488_v43 = vsub.f32 %v474_v41, %v487_v42  ;;  %1579 = vrcp.f32 %v457_v52  ;;  %vm463_vm5 = vweird.f32 %v457_v52  ;;  %v469_v62 = vand.u32 2147483648, %v457_v52 }
  0xd7   : > { %1581 = vrcp.f32 %v491_v54  ;;  %v467_v0 = vand.u32 2147483647, %v457_v52  ;;  %v503_v9 = vand.u32 2147483648, %v491_v54  ;;  %vm497_vm10 = vweird.f32 %v491_v54 }
  0xd8   : > { %533 = vmatpush.msra.mxu3 %v488_v43  ;;  %v470_v5 = vor.u32 1.1754944e-38, %v469_v62  ;;  %v501_v10 = vand.u32 2147483647, %v491_v54 }
  0xd9   : > { %1419 = vmatmul.msk.f32.vlgmr.msra.gmra.mxu3 %vm514_vm3, %v1418_v45  ;;  %vm468_vm8 = vcmp.eq.f32.partialorder %v467_v0, 8.507059e+37  ;;  %v504_v14 = vor.u32 1.1754944e-38, %v503_v9  ;;  %v1235_v9 = vld [vmem:[#allocation11 + $0x20] sm:$0xff] }
  0xda   : > { %vm502_vm12 = vcmp.eq.f32.partialorder %v501_v10, 8.507059e+37  ;;  %v1234_v10 = vld [vmem:[#allocation11 + $0x18] sm:$0xff] }
  0xdc   : > { %v1580_v55 = vpop.eup %1579 }
  0xdd   : > { %v459_v56 = vmul.f32 %v1580_v55, %v457_v52  ;;  %v1582_v57 = vpop.eup %1581  ;;  %vm464_vm6 = vweird.f32 %v1580_v55 }
  0xde   : > { %v493_v58 = vmul.f32 %v1582_v57, %v491_v54  ;;  %vm465_vm7 = vmor %vm463_vm5, %vm464_vm6  ;;  %vm498_vm9 = vweird.f32 %v1582_v57 }
  0xdf   : > { %v460_v59 = vsub.f32 1.0, %v459_v56  ;;  %vm499_vm11 = vmor %vm497_vm10, %vm498_vm9 }
  0xe0   : > { %v494_v60 = vsub.f32 1.0, %v493_v58 }
  0xe1   : > { %v461_v61 = vmul.f32 %v1580_v55, %v460_v59 }
  0xe2   : > { %v495_v2 = vmul.f32 %v1582_v57, %v494_v60 }
  0xe3   : > { %v462_v63 = vadd.f32 %v1580_v55, %v461_v61 }
  0xe4   : > { %v496_v8 = vadd.f32 %v1582_v57, %v495_v2  ;;  %v1846_v2 = vmov 64.0  }
  0xe5   : > { %v466_v7 = vsel %vm465_vm7, %v1580_v55, %v462_v63 }
  0xe6   : > { %v471_v11 = vsel %vm468_vm8, %v470_v5, %v466_v7  ;;  %v500_v12 = vsel %vm499_vm11, %v1582_v57, %v496_v8  ;;  %v1236_v7 = vld [vmem:[#allocation11 + $0x28] sm:$0xff] }
  0xe7   : > { %v473_v15 = vmul.f32 %v471_v11, %v395_v46  ;;  %v505_v17 = vsel %vm502_vm12, %v504_v14, %v500_v12  ;;  %v1233_v12 = vld [vmem:[#allocation11 + $0x10] sm:$0xff]  ;;  %v1231_v14 = vld [vmem:[#allocation11] sm:$0xff] }
 0x13b   : > { %v685_v25 = vpop.permute.xlu1 %684 }
 0x15c   : > { %v535_v1 = vpop.f32.mrf.mxu3 }
 0x15d   : > { %v538_v3 = vmul.f32 1.442695, %v535_v1  ;;  %v542_v4 = vsub.f32 0.0, %v535_v1 }
 0x15f   : > { %1583 = vpow2.f32 %v538_v3  ;;  %v543_v6 = vmul.f32 1.442695, %v542_v4  ;;  %v1238_v4 = vld [vmem:[#allocation11 + $0x38] sm:$0xff] }
 0x161   : > { %1585 = vpow2.f32 %v543_v6  ;;  %v1237_v6 = vld [vmem:[#allocation11 + $0x30] sm:$0xff] }
 0x162   : > { %1587 = vrcp.f32 %v1846_v2 }
 0x165   : > { %v1584_v13 = vpop.eup %1583 }
 0x166   : > { %v540_v18 = vmul.f32 %v1584_v13, %v473_v15  ;;  %v1232_v13 = vld [vmem:[#allocation11 + $0x8] sm:$0xff] }
 0x167   : > { %v1586_v16 = vpop.eup %1585 }
 0x168   : > { %v545_v19 = vmul.f32 %v1586_v16, %v505_v17  ;;  %v541_v21 = vmul.f32 0.25, %v540_v18  ;;  %v1588_v3 = vpop.eup %1587 }
 0x169   : > { %v1207_v5 = vmul.f32 64.0, %v1588_v3  ;;  %vm1211_vm15 = vweird.f32 %v1588_v3 }
 0x16a   : > { %799 = vrot.lane.b32.xlu2 %v545_v19, %s1841_s8  ;;  %715 = vrot.lane.b32.xlu1 %v545_v19, %s1842_s11 }
 0x16b   : > { %630 = vrot.lane.b32.xlu0 %v545_v19, %s1840_s28  ;;  %1420 = vmatpush.xpose.msk.msrb.mxu3 %vm356_vm4, %v545_v19  ;;  %v1208_v8 = vsub.f32 1.0, %v1207_v5 }
 0x16d   : > { %v1209_v11 = vmul.f32 %v1588_v3, %v1208_v8 }
 0x16e   : > { %1421 = vmatmul.msk.f32.vlgmr.msrb.gmra.mxu3 %vm356_vm4, %v541_v21 }
 0x16f   : > { %1422 = vmatpush.xpose.msk.msra.mxu3 %vm356_vm4, %v547_v20  ;;  %v1210_v15 = vadd.f32 %v1588_v3, %v1209_v11 }
 0x171   : > { %v1212_v16 = vsel %vm1211_vm15, %v1588_v3, %v1210_v15 }
 0x172   : > { %713 = vrot.lane.b32.xlu2 %v541_v21, %s1842_s11  ;;  %768 = vrot.lane.b32.xlu1 %v2025_v51, %s1842_s11  ;;  %s1279_s11 = sshll.u32 %s1275_s9, 4  ;;  %s1280_s11 = int_to_ptr.hbm [resolvable:$true] %s1279_s11 }
 0x173   : > { %1423 = vmatpush.xpose.msk.msra.mxu3 %vm356_vm4, %v546_v22  ;;  %628 = vrot.lane.b32.xlu0 %v541_v21, %s1840_s28  ;;  %s351_s28 = scalar_lea.vmem [#allocation12], %s1409_s7 }
 0x176   : > { %1424 = vmatmul.msk.f32.vlgmr.msra.gmra.mxu3 %vm356_vm4, %v541_v21 }
 0x177   : > { %1428 = vmatpush.xpose.msk.msrb.mxu3 %vm356_vm4, %v627_v23 }
 0x17a   : > { %852 = vrot.lane.b32.xlu2 %v2025_v51, %s1841_s8 }
 0x17b   : > { %797 = vrot.lane.b32.xlu0 %v541_v21, %s1841_s8  ;;  %1429 = vmatpush.xpose.msk.msrb.mxu3 %vm356_vm4, %v626_v24  ;;  %s1277_s8 = sshll.u32 %s351_s28, 4  ;;  %s1278_s8 = int_to_ptr.vmem [resolvable:$true] %s1277_s8 }
 0x17f   : > { %705 = vmatpush.msra.mxu3 %v685_v25 }
 0x1c4   : > { %v800_v26 = vpop.permute.xlu2 %799 }
 0x1cc   : > { %v714_v27 = vpop.permute.xlu2 %713 }
 0x1d4   : > { %v853_v32 = vpop.permute.xlu2 %852 }
 0x1dc   : > { %v716_v28 = vpop.permute.xlu1 %715 }
 0x1dd   : > { %v631_v30 = vpop.permute.xlu0 %630  ;;  %1432 = vmatpush.xpose.msk.msra.mxu0 %vm356_vm4, %v716_v28 }
 0x1de   : > { %1426 = vmatpush.xpose.msk.msrb.mxu1 %vm356_vm4, %v631_v30 }
 0x1e2   : > { %1434 = vmatpush.xpose.msk.msra.mxu1 %vm356_vm4, %v712_v29 }
 0x1e4   : > { %v769_v33 = vpop.permute.xlu1 %768 }
 0x1e5   : > { %v629_v34 = vpop.permute.xlu0 %628  ;;  %789 = vmatpush.msrb.mxu2 %v769_v33 }
 0x1e6   : > { %1435 = vmatpush.xpose.msk.msra.mxu1 %vm356_vm4, %v711_v31  ;;  %1430 = vmatmul.msk.f32.vlgmr.msrb.gmra.mxu3 %vm356_vm4, %v629_v34 }
 0x1e7   : > { %1427 = vmatmul.msk.f32.vlgmr.msrb.gmra.mxu1 %vm356_vm4, %v629_v34  ;;  %1438 = vmatpush.xpose.msk.msrb.mxu3 %vm356_vm4, %v800_v26  ;;  %v1570_v26 = vld [vmem:[%s2125_s4] ss:$0 sm:$0xff] }
 0x1e8   : > { %1250 = vmatpush.msra.mxu2 %v1238_v4 }
 0x1ea   : > { %873 = vmatpush.msrb.mxu1 %v853_v32  ;;  %1251 = vmatpush.msra.mxu2 %v1237_v6 }
 0x1ec   : > { %1252 = vmatpush.msra.mxu2 %v1236_v7 }
 0x1ed   : > { %v798_v39 = vpop.permute.xlu0 %797 }
 0x1ee   : > { %1253 = vmatpush.msra.mxu2 %v1235_v9 }
 0x1ef   : > { %1436 = vmatmul.msk.f32.vlgmr.msra.gmra.mxu1 %vm356_vm4, %v714_v27 }
 0x1f0   : > { %1254 = vmatpush.msra.mxu2 %v1234_v10 }
 0x1f1   : > { %v572_v35 = vpop.f32.mrf.mxu3 }
 0x1f2   : > { %v575_v37 = vsel %vm2018_vm1, %v572_v35, 0.0  ;;  %1255 = vmatpush.msra.mxu2 %v1233_v12 }
 0x1f3   : > { %1425 = vmatmul.msk.f32.vlgmr.msrb.gmra.mxu0 %vm514_vm3, %v575_v37 }
 0x1f4   : > { %1440 = vmatpush.xpose.msk.msrb.mxu0 %vm356_vm4, %v796_v36  ;;  %1256 = vmatpush.msra.mxu2 %v1232_v13 }
 0x1f6   : > { %1257 = vmatpush.msra.mxu2 %v1231_v14 }
 0x1f8   : > { %1441 = vmatpush.xpose.msk.msrb.mxu0 %vm356_vm4, %v795_v38 }
 0x1f9   : > { %v599_v43 = vpop.f32.mrf.mxu3 }
 0x1fb   : > { %1433 = vmatmul.msk.f32.vlgmr.msra.gmra.mxu0 %vm356_vm4, %v714_v27 }
 0x203   : > { %1442 = vmatmul.msk.f32.vlgmr.msrb.gmra.mxu0 %vm356_vm4, %v798_v39 }
 0x264   : > { %v653_v41 = vpop.f32.mrf.mxu1 }
 0x265   : > { %v656_v42 = vsel %vm2018_vm1, %v653_v41, 0.0 }
 0x266   : > { %1431 = vmatmul.msk.f32.vlgmr.msra.gmra.mxu3 %vm514_vm3, %v656_v42 }
 0x269   : > { %v680_v48 = vpop.f32.mrf.mxu3 }
 0x26c   : > { %v765_v53 = vpop.f32.mrf.mxu1 }
 0x26e   : > { %1439 = vmatmul.msk.f32.vlgmr.msrb.gmra.mxu3 %vm356_vm4, %v798_v39 }
 0x270   : > { %v622_v44 = vpop.f32.mrf.mxu0 }
 0x271   : > { %v623_v45 = vadd.f32 %v622_v44, %v599_v43 }
 0x278   : > { %v738_v46 = vpop.f32.mrf.mxu0 }
 0x279   : > { %v741_v47 = vsel %vm2018_vm1, %v738_v46, 0.0 }
 0x27a   : > { %1437 = vmatmul.msk.f32.vlgmr.msrb.gmra.mxu2 %vm514_vm3, %v741_v47 }
 0x280   : > { %v849_v56 = vpop.f32.mrf.mxu0 }
 0x2e9   : > { %v707_v49 = vpop.f32.mrf.mxu3 }
 0x2ea   : > { %v708_v50 = vadd.f32 %v707_v49, %v680_v48 }
 0x2ec   : > { %879 = vrot.lane.b32.xlu0 %v708_v50, %s1843_s30  ;;  %s1264_s30 = scalar_lea.sflag [#allocation5], %s1994_s19 }
 0x2f1   : > { %v822_v51 = vpop.f32.mrf.mxu3 }
 0x2f2   : > { %v825_v52 = vsel %vm2018_vm1, %v822_v51, 0.0 }
 0x2f3   : > { %1443 = vmatmul.msk.f32.vlgmr.msrb.gmra.mxu1 %vm514_vm3, %v825_v52 }
 0x2fd   : > { %v791_v54 = vpop.f32.mrf.mxu2 }
 0x2fe   : > { %v792_v55 = vadd.f32 %v791_v54, %v765_v53 }
 0x300   : > { %883 = vrot.lane.b32.xlu1 %v792_v55, %s1844_s10  ;;  %s1755_s10 = sshra.s32 %s1280_s11, 4  ;;  %s1756_s10 = int_to_ptr.hbm [resolvable:$true] %s1755_s10 }
 0x301   : > { %p1762_p9 = scmp.lt.s32.totalorder %s1756_s10, %s2127_s6 }
 0x35e   : > { %v880_v59 = vpop.permute.xlu0 %879 }
 0x35f   : > { %v890_v61 = vsel %vm356_vm4, %v623_v45, %v880_v59 }
 0x370   : > { %v875_v57 = vpop.f32.mrf.mxu1 }
 0x371   : > { %v876_v58 = vadd.f32 %v875_v57, %v849_v56 }
 0x372   : > { %v884_v60 = vpop.permute.xlu1 %883 }
 0x373   : > { %887 = vrot.lane.b32.xlu2 %v876_v58, %s1845_s12  ;;  %v892_v40 = vsel %vm891_vm13, %v890_v61, %v884_v60  ;;  %s1757_s12 = scalar_lea.hbm %s1756_s10, 8 }
 0x374   : > { %p1758_p1 = scmp.ne.s32.totalorder %s1756_s10, %s1757_s12  ;;  %p1763_p10 = scmp.lt.s32.totalorder %s1761_s17, %s1757_s12 }
 0x376   : > { %p1759_p3 = pnand %p1758_p1, %p1974_p0  ;;  %p1764_p12 = por %p1763_p10, %p1762_p9 }
 0x378   : > { %p1760_p8 = pneg %p1759_p3 }
 0x37a   : > { %p1765_p13 = pnand %p1764_p12, %p1760_p8 }
 0x3cd   : > { %v888_v62 = vpop.permute.xlu2 %887 }
 0x3ce   : > { %v894_v63 = vsel %vm893_vm14, %v892_v40, %v888_v62 }
 0x3cf   : > { %v1202_v0 = vmul.f32 %v894_v63, %v894_v63 }
 0x3d1   : > { %v1203_v1 = vsel %vm374_vm0, %v1202_v0, 0.0 }
 0x3d2   : > { %1204 = vadd.xlane.f32.xlu0 %v1203_v1 }
 0x445   : > { %v1205_v17 = vpop.xlane.xlu0 %1204 }
 0x446   : > { %v1213_v18 = vmul.f32 %v1212_v16, %v1205_v17 }
 0x448   : > { %v1214_v19 = vadd.f32 1e-05, %v1213_v18 }
 0x44a   : > { %1589 = vrsqrt.f32 %v1214_v19  ;;  %vm1221_vm2 = vweird.f32 %v1214_v19 }
 0x450   : > { %v1590_v20 = vpop.eup %1589 }
 0x451   : > { %v1216_v21 = vmul.f32 %v1590_v20, %v1214_v19  ;;  %vm1222_vm1 = vweird.f32 %v1590_v20 }
 0x452   : > { %vm1223_vm3 = vmor %vm1221_vm2, %vm1222_vm1 }
 0x453   : > { %v1217_v22 = vmul.f32 %v1590_v20, %v1216_v21 }
 0x455   : > { %v1218_v23 = vmul.f32 0.5, %v1217_v22 }
 0x457   : > { %v1219_v24 = vsub.f32 1.5, %v1218_v23 }
 0x459   : > { %v1220_v25 = vmul.f32 %v1590_v20, %v1219_v24 }
 0x45b   : > { %v1224_v27 = vsel %vm1223_vm3, %v1590_v20, %v1220_v25 }
 0x45c   : > { %v1225_v28 = vmul.f32 %v1224_v27, %v894_v63 }
 0x45e   : > { %v1230_v29 = vmul.f32 %v1570_v26, %v1225_v28 }
 0x460   : > { %1452 = vmatmul.msk.f32.vlgmr.msra.gmra.mxu2 %vm374_vm0, %v1230_v29 }
 0x4e3   : > { %v1259_v30 = vpop.f32.mrf.mxu2 }
 0x4e4   : > { %1262 = vst.msk [vmem:[%s351_s28] sm:$0xff] %vm374_vm0, %v1259_v30 }
 0x4e5   : > { %1768 = shalt.err (!%p1765_p13)
}
 0x4e6   : > { %1475 = dma.vmem_to_hbm [thread:$0]  (%p1974_p0), %s1278_s8, 128, %s1280_s11, %s1264_s30  }
 0x4e7 PF: > { %s1291_s19 = sand.u32 1, %s1811_s21   ;;  %p1495_p2 = pnand %p1405_p6, %p1981_p5 }
 0x4e8   : > { %s1292_s18 = scalar_lea.sflag [#allocation5], %s1291_s19 }
 0x4e9   : > { %p1496_p4 = pneg %p1495_p2 }
 0x4eb   : > { %1806 = dma.done.wait (%p1496_p4), %s1292_s18, 128  }
 0x4ec   : > { %1808 = vsyncadd (%p1496_p4), %s1292_s18, 4294967168  ;;  %s24_s26 = sadd.s32 1, %s1831_s26   ;;  %s2136_s21 = smov %s1815_s22 }
 0x4ed   : > { %p21_p7 = scmp.ge.s32.totalorder %s24_s26, 4   ;;  %s2137_s22 = smov %s1819_s23 }
 0x4ee   : > { %s2138_s23 = smov %s1979_s16  ;;  %s2139_s24 = smov %s1827_s25 }
 0x4ef   : > { %s2140_s25 = smov %s2142_s14  ;;  %23 = sbr.rel (!%p21_p7) target bundleno = 8 (0x8), region = 116 }
 0x4f4   :  { %1298 = vsyncpa [#allocation4], 1 }
 0x4f5   :  { %1300 = vsyncpa [#allocation4 + $0x1], 1 }
 0x4f6   :  { %1301 = vsyncpa [#allocation7], 1 }
 0x4f7   :  { %1302 = vsyncpa [#allocation10], 1 }
 0x4f8   :  { %1303 = vsyncpa [#allocation5], 1 }
 0x4f9   :  { %1305 = vsyncpa [#allocation5 + $0x1], 1 }

</bundles_post_ra>
